<compile_context>
chip_gen: v7x
topology: tpu7x:2x2x1
jax: 0.10.0
libtpu: 0.0.40
codegen_flags: <defaults>
</compile_context>

<pallas_src>
import jax
import jax.numpy as jnp
from jax.experimental import pallas as pl
from jax.experimental.pallas import tpu as pltpu

_LANES = 128
_SUBLANES = 8


def _cdiv(a, b):
    return -(-a // b)


def _round_up(x, m):
    return _cdiv(x, m) * m


def _vmem_capacity_bytes():
    try:
        return int(pltpu.get_tpu_info().vmem_capacity_bytes)
    except Exception:
        return 64 * 1024 * 1024  # conservative (v7x per-TC VMEM)


def _num_parallel_cores():
    # Only v7x exposes 2 TensorCores per chip to one Mosaic kernel; on v5e/v6e a
    # "parallel" grid split is just a serial loop, so report 1 there.
    try:
        kind = jax.devices()[0].device_kind.lower()
    except Exception:
        return 1
    return 2 if ("7x" in kind or "v7" in kind) else 1


def _pick_tiling(B, A, in_itemsize, vmem_budget_bytes, n_tc,
                 target_tile_bytes=8 * 1024 * 1024):
    # Sublane packing multiple: 8 rows/vreg for f32, 16 for bf16, 32 for int8/fp8.
    sub_mult = _SUBLANES * max(1, 4 // in_itemsize)

    # VMEM budget per block row: double-buffered input tile plus ~2 full-width f32
    # streaming temporaries (the exp/mul chain streams vreg-by-vreg).
    per_row = A * (2 * in_itemsize + 2 * 4)
    rows_budget = max(vmem_budget_bytes // max(per_row, 1), sub_mult)

    # Byte-targeted tile: ~8 MiB of input per buffer keeps the fixed per-grid-step
    # overhead (~0.35 us) well below the DMA time even at v7x's 3.2 TB/s.
    rows_target = max(target_tile_bytes // max(A * in_itemsize, 1), sub_mult)

    rows = min(rows_budget, rows_target, _round_up(B, sub_mult))
    rows -= rows % sub_mult
    rows = max(rows, sub_mult)
    n_blocks = _cdiv(B, rows)

    # On v7x, feed both TensorCores; prefer an even block count (equal loading, no
    # duplicated/clamped trailing block) by shrinking the tile slightly if needed.
    n_par = 1
    if n_tc >= 2 and n_blocks >= 2:
        if n_blocks % 2:
            cand = max(_round_up(_cdiv(B, n_blocks + 1), sub_mult), sub_mult)
            if _cdiv(B, cand) % 2 == 0:
                rows, n_blocks = cand, _cdiv(B, cand)
        if n_blocks % 2 == 0:
            n_par = 2

    # Rebalance rows evenly across the chosen block count (only if it keeps it).
    cand = max(_round_up(_cdiv(B, n_blocks), sub_mult), sub_mult)
    if _cdiv(B, cand) == n_blocks:
        rows = cand

    n_steps = _cdiv(n_blocks, n_par)
    return rows, n_blocks, n_par, n_steps


def entropy_loss(logits, *, block_rows=None):
    """Returns -Categorical(logits).entropy().sum() as a fused Pallas TPU kernel.

    `logits` may be float32 or bfloat16; compute is f32, output is a f32 scalar.
    """
    B, A = logits.shape
    in_itemsize = jnp.dtype(logits.dtype).itemsize

    vmem_cap = _vmem_capacity_bytes()
    vmem_limit = int(min(vmem_cap * 3 // 4, 96 * 1024 * 1024))
    n_tc = _num_parallel_cores()

    if block_rows is None:
        block_rows, n_blocks, n_par, n_steps = _pick_tiling(
            B, A, in_itemsize, int(vmem_limit * 0.8), n_tc)
    else:
        assert block_rows % _SUBLANES == 0 or block_rows == B, (
            "block_rows must be a multiple of 8 or equal to the batch size")
        n_blocks = _cdiv(B, block_rows)
        n_par = 2 if (n_tc >= 2 and n_blocks >= 2 and n_blocks % 2 == 0) else 1
        n_steps = _cdiv(n_blocks, n_par)

    # n_par * n_steps == n_blocks by construction -> no clamped/duplicated blocks.
    needs_mask = n_blocks * block_rows > B

    def kernel(logits_ref, out_ref, acc_ref):
        p = pl.program_id(0)
        i = pl.program_id(1)

        @pl.when(i == 0)
        def _():
            acc_ref[0] = jnp.float32(0.0)

        x = logits_ref[...].astype(jnp.float32)                # (TB, A)

        m = jnp.max(x, axis=-1, keepdims=True)                 # (TB, 1)
        z = x - m
        ez = jnp.exp(z)                                        # EUP
        s = jnp.sum(ez, axis=-1, keepdims=True)                # (TB, 1)
        t = jnp.sum(ez * z, axis=-1, keepdims=True)            # (TB, 1)
        # -H_row = sum_a p*logp = t/s - log(s); pad/garbage rows are killed below
        # (row-wise reductions cannot contaminate valid rows).
        row_vals = t / s - jnp.log(s)                          # (TB, 1)

        if needs_mask:
            row0 = (p * n_steps + i) * block_rows
            local = jax.lax.broadcasted_iota(jnp.int32, (block_rows, 1), 0)
            valid = (row0 + local) < B
            row_vals = jnp.where(valid, row_vals, 0.0)

        acc_ref[0] = acc_ref[0] + jnp.sum(row_vals)

        @pl.when(i == n_steps - 1)
        def _():
            # Single lane-dense write of this slice's scalar partial.
            out_ref[...] = jnp.zeros(out_ref.shape, out_ref.dtype) + acc_ref[0]

    out = pl.pallas_call(
        kernel,
        out_shape=jax.ShapeDtypeStruct((n_par, _SUBLANES, _LANES), jnp.float32),
        grid_spec=pltpu.PrefetchScalarGridSpec(
            num_scalar_prefetch=0,
            grid=(n_par, n_steps),
            in_specs=[pl.BlockSpec((block_rows, A),
                                   lambda p, i: (p * n_steps + i, 0))],
            out_specs=pl.BlockSpec((1, _SUBLANES, _LANES), lambda p, i: (p, 0, 0)),
            scratch_shapes=[pltpu.SMEM((1,), jnp.float32)],
        ),
        compiler_params=pltpu.CompilerParams(
            dimension_semantics=("parallel", "arbitrary"),
            vmem_limit_bytes=vmem_limit,
        ),
    )(logits)

    # Each parallel slice's partial is broadcast over its (8, 128) block.
    return jnp.sum(out[:, 0, 0])


def _reference_loss(logits):
    logp = jax.nn.log_softmax(logits.astype(jnp.float32), axis=-1)
    ent = -jnp.sum(jnp.exp(logp) * logp, axis=-1)
    return -jnp.sum(ent)


if __name__ == "__main__":
    key = jax.random.PRNGKey(0)
    B, A = 16, 128  # small: 16 samples, 128 discrete actions
    logits = jax.random.normal(key, (B, A), dtype=jnp.float32)

    loss = entropy_loss(logits)
    jax.block_until_ready(loss)
    loss_ref = _reference_loss(logits)
    assert jnp.allclose(loss, loss_ref, rtol=1e-5, atol=1e-5), (loss, loss_ref)

    # Ragged batch: single padded block, tail-row masking.
    logits2 = jax.random.normal(jax.random.PRNGKey(1), (20, A), dtype=jnp.float32)
    loss2 = entropy_loss(logits2)
    jax.block_until_ready(loss2)
    loss2_ref = _reference_loss(logits2)
    assert jnp.allclose(loss2, loss2_ref, rtol=1e-5, atol=1e-5), (loss2, loss2_ref)

    # Forced small tile: exercises the multi-step grid + SMEM accumulator path.
    loss3 = entropy_loss(logits2, block_rows=8)
    jax.block_until_ready(loss3)
    assert jnp.allclose(loss3, loss2_ref, rtol=1e-5, atol=1e-5), (loss3, loss2_ref)

    # bf16 logits (halves HBM traffic); math stays f32, tolerance relaxed for bf16.
    logits4 = jax.random.normal(jax.random.PRNGKey(2), (B, A)).astype(jnp.bfloat16)
    loss4 = entropy_loss(logits4)
    jax.block_until_ready(loss4)
    loss4_ref = _reference_loss(logits4)
    assert jnp.allclose(loss4, loss4_ref, rtol=1e-3, atol=1e-3), (loss4, loss4_ref)

    print("KERNEL_OK")
</pallas_src>

<mosaic_0001>
module attributes {stable_mosaic.version = 11 : i64} {
  func.func @kernel(%arg0: i32, %arg1: i32, %arg2: memref<16x128xf32, #tpu.memory_space<vmem>>, %arg3: memref<1x8x128xf32, #tpu.memory_space<vmem>>, %arg4: memref<1xf32, #tpu.memory_space<smem>>) attributes {dimension_semantics = [#tpu.dimension_semantics<parallel>, #tpu.dimension_semantics<arbitrary>], iteration_bounds = array<i64: 1, 1>, scalar_prefetch = 0 : i64, scratch_operands = 1 : i64, tpu.core_type = #tpu.core_type<tc>, window_params = [{transform_indices = @transform_0, window_bounds = array<i64: 16, 128>}, {transform_indices = @transform_1, window_bounds = array<i64: 1, 8, 128>}]} {
    %c0_i32 = arith.constant 0 : i32
    %0 = arith.cmpi eq, %arg1, %c0_i32 : i32
    %1 = arith.extui %0 : i1 to i32
    %c0_i32_0 = arith.constant 0 : i32
    %2 = arith.cmpi ne, %1, %c0_i32_0 : i32
    scf.if %2 {
      %cst_9 = arith.constant 0.000000e+00 : f32
      %c0_10 = arith.constant 0 : index
      %27 = memref.load %arg4[%c0_10] : memref<1xf32, #tpu.memory_space<smem>>
      memref.store %cst_9, %arg4[%c0_10] : memref<1xf32, #tpu.memory_space<smem>>
    } else {
    }
    %c0 = arith.constant 0 : index
    %c0_1 = arith.constant 0 : index
    %3 = vector.load %arg2[%c0, %c0_1] : memref<16x128xf32, #tpu.memory_space<vmem>>, vector<16x128xf32>
    %cst = arith.constant dense<0xFF800000> : vector<16xf32>
    %4 = vector.multi_reduction <maximumf>, %3, %cst [1] : vector<16x128xf32> to vector<16xf32>
    %5 = vector.shape_cast %4 : vector<16xf32> to vector<16x1xf32>
    %6 = vector.broadcast %5 : vector<16x1xf32> to vector<16x128xf32>
    %7 = arith.subf %3, %6 : vector<16x128xf32>
    %8 = math.exp %7 : vector<16x128xf32>
    %cst_2 = arith.constant dense<0.000000e+00> : vector<16xf32>
    %9 = vector.multi_reduction <add>, %8, %cst_2 [1] : vector<16x128xf32> to vector<16xf32>
    %10 = vector.shape_cast %9 : vector<16xf32> to vector<16x1xf32>
    %11 = arith.mulf %8, %7 : vector<16x128xf32>
    %cst_3 = arith.constant dense<0.000000e+00> : vector<16xf32>
    %12 = vector.multi_reduction <add>, %11, %cst_3 [1] : vector<16x128xf32> to vector<16xf32>
    %13 = vector.shape_cast %12 : vector<16xf32> to vector<16x1xf32>
    %14 = arith.divf %13, %10 : vector<16x1xf32>
    %15 = math.log %10 : vector<16x1xf32>
    %16 = arith.subf %14, %15 : vector<16x1xf32>
    %c0_4 = arith.constant 0 : index
    %17 = memref.load %arg4[%c0_4] : memref<1xf32, #tpu.memory_space<smem>>
    %18 = vector.shape_cast %16 : vector<16x1xf32> to vector<1x16x1xf32>
    %cst_5 = arith.constant dense<0.000000e+00> : vector<1xf32>
    %19 = vector.multi_reduction <add>, %18, %cst_5 [1, 2] : vector<1x16x1xf32> to vector<1xf32>
    %20 = vector.shape_cast %19 : vector<1xf32> to vector<1x1x1xf32>
    %21 = vector.extract %20[0, 0, 0] : f32 from vector<1x1x1xf32>
    %22 = arith.addf %17, %21 : f32
    %c0_6 = arith.constant 0 : index
    %23 = memref.load %arg4[%c0_6] : memref<1xf32, #tpu.memory_space<smem>>
    memref.store %22, %arg4[%c0_6] : memref<1xf32, #tpu.memory_space<smem>>
    %c0_i32_7 = arith.constant 0 : i32
    %24 = arith.cmpi eq, %arg1, %c0_i32_7 : i32
    %25 = arith.extui %24 : i1 to i32
    %c0_i32_8 = arith.constant 0 : i32
    %26 = arith.cmpi ne, %25, %c0_i32_8 : i32
    scf.if %26 {
      %cst_9 = arith.constant 0.000000e+00 : f32
      %27 = vector.broadcast %cst_9 : f32 to vector<1x8x128xf32>
      %c0_10 = arith.constant 0 : index
      %28 = memref.load %arg4[%c0_10] : memref<1xf32, #tpu.memory_space<smem>>
      %29 = vector.broadcast %28 : f32 to vector<1x8x128xf32>
      %30 = arith.addf %27, %29 : vector<1x8x128xf32>
      %c0_11 = arith.constant 0 : index
      %c0_12 = arith.constant 0 : index
      %c0_13 = arith.constant 0 : index
      %31 = vector.load %arg3[%c0_11, %c0_12, %c0_13] : memref<1x8x128xf32, #tpu.memory_space<vmem>>, vector<1x8x128xf32>
      tpu.vector_store %arg3[%c0_11, %c0_12, %c0_13], %30 {strides = array<i32>} : memref<1x8x128xf32, #tpu.memory_space<vmem>>, vector<1x8x128xf32>,
    } else {
    }
    return
  }
  func.func @transform_0(%arg0: i32, %arg1: i32) -> (i32, i32) {
    %c1_i32 = arith.constant 1 : i32
    %0 = arith.muli %arg0, %c1_i32 : i32
    %1 = arith.addi %0, %arg1 : i32
    %c0_i32 = arith.constant 0 : i32
    %c0_i32_0 = arith.constant 0 : i32
    return %1, %c0_i32 : i32, i32
  }
  func.func @transform_1(%arg0: i32, %arg1: i32) -> (i32, i32, i32) {
    %c0_i32 = arith.constant 0 : i32
    %c0_i32_0 = arith.constant 0 : i32
    %c0_i32_1 = arith.constant 0 : i32
    return %arg0, %c0_i32, %c0_i32_0 : i32, i32, i32
  }
}

</mosaic_0001>

<bundles_post_ra>
// kernel: tpu_custom_call.1
= control target key start
LH: loop header
LB: loop body
LE: loop exit
PB: predicated region body
PF: predicated region fallthrough
CT: control target
= control target key end

     0   :  { %6 = vsyncpa [#allocation4], 0  ;;  %s210_s0 = inlined_call_operand.hbm [shape: f32[16,128], index: 0, kind: input, shape index: {}]   ;;  %s211_s1 = inlined_call_operand.hbm [shape: f32[1,8,128], index: 1, kind: output, shape index: {}]  }
   0x1   :  { %7 = vsyncpa [#allocation5], 0  ;;  %s172_s6 = smov [#allocation3]   ;;  %s124_s10 = scalar_lea.hbm %s210_s0, 256 }
   0x2   :  { %s17_s7 = sshll.u32 %s172_s6, 4  ;;  %p125_p0 = scmp.ne.s32.totalorder %s210_s0, %s124_s10  ;;  %s18_s7 = int_to_ptr.vmem [resolvable:$true] %s17_s7 }
   0x3   :  { %p128_p1 = scmp.lt.u32.totalorder %s124_s10, %s210_s0 }
   0x5   :  { %p130_p2 = pnand %p128_p1, %p125_p0 }
   0x7   :  { %133 = shalt.err (!%p130_p2)
}
   0x8   :  { %s134_s15 = scalar_lea.vmem %s18_s7, 256  ;;  %p139_p4 = scmp.lt.s32.totalorder %s18_s7, %s18_s7 }
   0x9   :  { %p135_p3 = scmp.ne.s32.totalorder %s18_s7, %s134_s15  ;;  %p140_p5 = scmp.lt.s32.totalorder %s134_s15, %s134_s15 }
   0xb   :  { %p141_p6 = por %p140_p5, %p139_p4 }
   0xd   :  { %p142_p7 = pnand %p141_p6, %p135_p3 }
   0xf   :  { %145 = shalt.err (!%p142_p7)
}
  0x10   :  { %s173_s16 = smov 128   ;;  %s174_s17 = smov 8  }
  0x11   :  { %23 = dma.hbm_to_vmem [thread:$0]  %s210_s0, 256, %s18_s7, [#allocation4], %s173_s16, %s173_s16, %s174_s17  }
  0x12   :  { %168 = dma.done.wait [#allocation4], 256  }
  0x13   :  { %169 = vsyncadd [#allocation4], 4294967040  ;;  %v35_v0 = vld [vmem:[#allocation3] sm:$0xff]  ;;  %v36_v1 = vld [vmem:[#allocation3 + $0x8] sm:$0xff]  ;;  %vm68_vm0 = vcmask 7168   ;;  %s175_s0 = smov [#allocation6]  }
  0x14   :  { %37 = vmax.xlane.f32.xlu0 %v35_v0  ;;  %s97_s20 = sshll.u32 %s175_s0, 4  ;;  %s98_s20 = int_to_ptr.vmem [resolvable:$true] %s97_s20 }
  0x15   :  { %s146_s22 = scalar_lea.vmem %s98_s20, 128  ;;  %p151_p9 = scmp.lt.s32.totalorder %s98_s20, %s98_s20 }
  0x16   :  { %p147_p8 = scmp.ne.s32.totalorder %s98_s20, %s146_s22  ;;  %p152_p10 = scmp.lt.s32.totalorder %s146_s22, %s146_s22 }
  0x18   :  { %39 = vmax.xlane.f32.xlu0 %v36_v1  ;;  %p153_p11 = por %p152_p10, %p151_p9 }
  0x1a   :  { %p154_p12 = pnand %p153_p11, %p147_p8 }
  0xa1   :  { %v38_v2 = vpop.xlane.xlu0 %37 }
  0xa2   :  { %v41_v3 = vsub.f32 %v35_v0, %v38_v2 }
  0xa4   :  { %v43_v4 = vmul.f32 1.442695, %v41_v3 }
  0xa5   :  { %v40_v5 = vpop.xlane.xlu0 %39 }
  0xa6   :  { %112 = vpow2.f32 %v43_v4  ;;  %v42_v6 = vsub.f32 %v36_v1, %v40_v5 }
  0xa8   :  { %v45_v7 = vmul.f32 1.442695, %v42_v6 }
  0xaa   :  { %114 = vpow2.f32 %v45_v7 }
  0xb0   :  { %v113_v8 = vpop.eup %112 }
  0xb1   :  { %47 = vadd.xlane.f32.xlu1 %v113_v8  ;;  %v51_v9 = vmul.f32 %v113_v8, %v41_v3 }
  0xb3   :  { %53 = vadd.xlane.f32.xlu0 %v51_v9 }
  0xb4   :  { %v115_v10 = vpop.eup %114 }
  0xb5   :  { %49 = vadd.xlane.f32.xlu1 %v115_v10  ;;  %v52_v11 = vmul.f32 %v115_v10, %v42_v6 }
  0xb9   :  { %55 = vadd.xlane.f32.xlu1 %v52_v11 }
 0x13e   :  { %v48_v12 = vpop.xlane.xlu1 %47 }
 0x13f   :  { %116 = vrcp.f32 %v48_v12 }
 0x140   :  { %118 = vlog2.f32 %v48_v12  ;;  %v54_v16 = vpop.xlane.xlu0 %53 }
 0x142   :  { %v50_v13 = vpop.xlane.xlu1 %49 }
 0x143   :  { %120 = vrcp.f32 %v50_v13 }
 0x144   :  { %122 = vlog2.f32 %v50_v13 }
 0x146   :  { %v56_v20 = vpop.xlane.xlu1 %55 }
 0x149   :  { %v117_v14 = vpop.eup %116 }
 0x14a   :  { %v119_v15 = vpop.eup %118  ;;  %v58_v18 = vmul.f32 %v117_v14, %v54_v16 }
 0x14b   :  { %v62_v17 = vmul.f32 0.6931472, %v119_v15 }
 0x14d   :  { %v121_v19 = vpop.eup %120  ;;  %v65_v23 = vsub.f32 %v58_v18, %v62_v17 }
 0x14e   :  { %v123_v21 = vpop.eup %122  ;;  %v60_v22 = vmul.f32 %v121_v19, %v56_v20 }
 0x14f   :  { %v64_v24 = vmul.f32 0.6931472, %v123_v21  ;;  %v69_v26 = vsel %vm68_vm0, %v65_v23, 0.0 }
 0x151   :  { %v66_v25 = vsub.f32 %v60_v22, %v64_v24 }
 0x153   :  { %v70_v27 = vsel %vm68_vm0, %v66_v25, 0.0 }
 0x154   :  { %v71_v28 = vadd.f32 %v70_v27, %v69_v26 }
 0x156   :  { %72 = vadd.xlane.f32.xlu0 %v71_v28 }
 0x1e3   :  { %v73_v29 = vpop.xlane.xlu0 %72 }
 0x1e4   :  { %v74_v30 = vrot.slane %v73_v29, 4 }
 0x1e6   :  { %v75_v31 = vadd.f32 %v74_v30, %v73_v29 }
 0x1e8   :  { %v76_v32 = vrot.slane %v75_v31, 2 }
 0x1ea   :  { %v77_v33 = vadd.f32 %v76_v32, %v75_v31 }
 0x1ec   :  { %v78_v34 = vrot.slane %v77_v33, 1 }
 0x1ee   :  { %v79_v35 = vadd.f32 %v78_v34, %v77_v33 }
 0x1f0   :  { %106 = vpush %v79_v35 }
 0x221   :  { %s107_s21 = spop %106 }
 0x222   :  { %v88_v36 = vstv %s107_s21 }
 0x223   :  { %90 = vst [vmem:[#allocation6] sm:$0xff] %v88_v36 }
 0x224   :  { %157 = shalt.err (!%p154_p12)
}
 0x225   :  { %s158_s25 = scalar_lea.hbm %s211_s1, 128 }
 0x226   :  { %p159_p13 = scmp.ne.s32.totalorder %s211_s1, %s158_s25  ;;  %p162_p0 = scmp.lt.u32.totalorder %s158_s25, %s211_s1 }
 0x228   :  { %p164_p1 = pnand %p162_p0, %p159_p13 }
 0x22a   :  { %167 = shalt.err (!%p164_p1)
}
 0x22b   :  { %100 = dma.vmem_to_hbm [thread:$0]  %s98_s20, 128, %s211_s1, [#allocation5]  }
 0x22c   :  { %170 = dma.done.wait [#allocation5], 128  }
 0x22d   :  { %171 = vsyncadd [#allocation5], 4294967168 }
 0x22e   :  { %104 = vsyncpa [#allocation4], 1 }
 0x22f   :  { %105 = vsyncpa [#allocation5], 1 }

</bundles_post_ra>
